<compile_context>
chip_gen: v7x
topology: tpu7x:2x2x1
jax: 0.10.0
libtpu: 0.0.40
codegen_flags: <defaults>
</compile_context>

<pallas_src>
import jax
import jax.numpy as jnp
from jax.experimental import pallas as pl
from jax.experimental.pallas import tpu as pltpu


def dense_att_kernel(u_ref, v_ref, adj_ref, out_ref):
    # u_ref:   (tm, 1)  f32  row term   x[i] @ w_left
    # v_ref:   (1, tn)  f32  col term   x[j] @ w_right + b
    # adj_ref: (tm, tn)      adjacency tile (any float dtype; cast inside)
    # out_ref: (tm, tn)
    s = u_ref[...] + v_ref[...]                    # broadcast add -> (tm, tn), VPU
    # sigmoid(s) == 0.5 * (tanh(0.5 * s) + 1): one EUP push per vreg instead of
    # exp + reciprocal, so the EUP slot never becomes the binding unit on v7x.
    att = 0.5 * jnp.tanh(0.5 * s) + 0.5
    adj = adj_ref[...].astype(jnp.float32)
    out_ref[...] = (adj * att).astype(out_ref.dtype)


def _round_up(n, q):
    return -(-n // q) * q


def _sublane_quantum(dtype):
    # f32 -> 8, bf16/f16 -> 16, int8/uint8/fp8 -> 32 sublanes per tile.
    return 8 * max(1, 4 // jnp.dtype(dtype).itemsize)


def _pick_tile(n, quantum, cap):
    """Largest multiple of `quantum` dividing n, capped at `cap`.
    `n` must already be a multiple of `quantum`."""
    t = max(quantum, (min(cap, n) // quantum) * quantum)
    while n % t != 0:
        t -= quantum
    return t


def dense_att(x, adj, weight, bias, *, tm=None, tn=None, out_dtype=jnp.float32):
    """Pallas implementation of DenseAtt.forward.

    x:      (n, d)      float
    adj:    (n, n)      dense adjacency; may be f32, bf16 or int8/uint8 (0/1
                        mask) -- narrower dtypes cut HBM traffic, cast to f32
                        inside the kernel.
    weight: (1, 2*d)    nn.Linear(2d, 1).weight
    bias:   (1,)        nn.Linear(2d, 1).bias
    out_dtype:          dtype of the result (f32 default; bf16 halves the
                        write-back stream).
    returns (n, n) out_dtype
    """
    n, d = x.shape
    assert adj.shape == (n, n)
    assert weight.shape == (1, 2 * d)

    out_dtype = jnp.dtype(out_dtype)
    adj_dtype = jnp.dtype(adj.dtype)

    # ---- hoisted, grid-invariant prologue (tiny: 2*n*d flops) -------------
    x32 = x.astype(jnp.float32)
    w = weight.astype(jnp.float32).reshape(2, d)            # rows: [w_left, w_right]
    uv = jnp.dot(x32, w.T)                                  # (n, 2): x read once
    u = uv[:, 0:1]                                          # (n, 1)
    v = uv[:, 1].reshape(1, n) + bias.astype(jnp.float32).reshape(1, 1)  # (1, n)

    # ---- pad to (sublane, lane)-aligned shapes so odd n never degenerates
    #      into full-array VMEM blocks ---------------------------------------
    row_q = max(8, _sublane_quantum(adj_dtype), _sublane_quantum(out_dtype))
    np_r = _round_up(n, row_q)
    np_c = _round_up(n, 128)
    if np_r != n:
        u = jnp.pad(u, ((0, np_r - n), (0, 0)))
        adj = jnp.pad(adj, ((0, np_r - n), (0, 0)))
    if np_c != n:
        v = jnp.pad(v, ((0, 0), (0, np_c - n)))
        adj = jnp.pad(adj, ((0, 0), (0, np_c - n)))

    # ---- tile selection ----------------------------------------------------
    # Keep tn lane-dense and large (unmasked vst, big contiguous DMA rows);
    # shrink tm to stay inside a conservative VMEM budget and to guarantee
    # >=4 grid steps so v7x's two TensorCores both get work.
    stream_bytes = 2 * (adj_dtype.itemsize + out_dtype.itemsize)  # double-buffered
    if tn is None:
        tn = _pick_tile(np_c, 128, 2048)
    if tm is None:
        budget = 20 * 1024 * 1024
        cap_m = max(row_q,
                    min(1024, (budget // (tn * stream_bytes)) // row_q * row_q))
        steps_cols = np_c // tn
        if steps_cols < 4:                      # megacore: want >=4 total steps
            want_rows = -(-4 // steps_cols)
            cap_m = min(cap_m, max(row_q, (np_r // want_rows) // row_q * row_q))
        tm = _pick_tile(np_r, row_q, cap_m)

    if (np_r % tm) or (np_c % tn) or (tm % row_q) or (tn % 128):
        raise ValueError(
            f"bad tiles tm={tm}, tn={tn} for padded shape ({np_r}, {np_c}); "
            f"tm must be a multiple of {row_q} dividing {np_r}, "
            f"tn a multiple of 128 dividing {np_c}")

    # ---- derived VMEM footprint / limit (never hardcode v7x's full 64 MiB) --
    tile_bytes = tm * tn * (adj_dtype.itemsize + out_dtype.itemsize)
    footprint = 2 * tile_bytes + 8 * (tm + tn)   # double-buffered streams + u/v
    if footprint > 40 * 1024 * 1024:
        raise ValueError(
            f"tiles tm={tm}, tn={tn} need ~{footprint >> 20} MiB of VMEM; "
            "pass smaller tiles")
    vmem_limit = min(max(int(1.5 * footprint) + (2 << 20), 16 << 20), 48 << 20)

    grid = (np_r // tm, np_c // tn)

    out = pl.pallas_call(
        dense_att_kernel,
        out_shape=jax.ShapeDtypeStruct((np_r, np_c), out_dtype),
        grid_spec=pltpu.PrefetchScalarGridSpec(
            num_scalar_prefetch=0,
            grid=grid,
            in_specs=[
                pl.BlockSpec((tm, 1), lambda i, j: (i, 0)),    # u column tile
                pl.BlockSpec((1, tn), lambda i, j: (0, j)),    # v row tile
                pl.BlockSpec((tm, tn), lambda i, j: (i, j)),   # adj tile
            ],
            out_specs=pl.BlockSpec((tm, tn), lambda i, j: (i, j)),
        ),
        compiler_params=pltpu.CompilerParams(
            dimension_semantics=("parallel", "parallel"),
            vmem_limit_bytes=vmem_limit,
        ),
    )(u, v, adj)

    if np_r != n or np_c != n:
        out = out[:n, :n]
    return out
    # TODO(synk): for many small graphs, stack adj into (B, n, n) and add a
    # leading "parallel" batch grid axis (or vmap this wrapper) to amortize
    # the per-call / per-step fixed overhead.


def dense_att_ref(x, adj, weight, bias):
    # Plain-JAX reference mirroring the PyTorch forward exactly.
    n, d = x.shape
    x_left = jnp.broadcast_to(x[:, None, :], (n, n, d))
    x_right = jnp.broadcast_to(x[None, :, :], (n, n, d))
    x_cat = jnp.concatenate((x_left, x_right), axis=2)          # (n, n, 2d)
    att = x_cat @ weight[0] + bias[0]                           # (n, n)
    att = jax.nn.sigmoid(att)
    return adj.astype(jnp.float32) * att


if __name__ == "__main__":
    key = jax.random.PRNGKey(0)
    kx, kadj, kw, kb = jax.random.split(key, 4)

    n, in_features = 256, 32
    x = jax.random.normal(kx, (n, in_features), dtype=jnp.float32)
    # Dense "adjacency" (the PyTorch code calls adj.to_dense()); 0/1 mask.
    adj = (jax.random.uniform(kadj, (n, n)) < 0.3).astype(jnp.float32)

    # nn.Linear(2*in_features, 1) parameters, deterministic init.
    bound = 1.0 / jnp.sqrt(2.0 * in_features)
    weight = jax.random.uniform(kw, (1, 2 * in_features), minval=-bound,
                                maxval=bound, dtype=jnp.float32)
    bias = jax.random.uniform(kb, (1,), minval=-bound, maxval=bound,
                              dtype=jnp.float32)

    ref = dense_att_ref(x, adj, weight, bias)

    # 1) f32 streams: matches the PyTorch/JAX reference.
    out = jax.block_until_ready(dense_att(x, adj, weight, bias))
    assert out.shape == (n, n)
    assert jnp.allclose(out, ref, atol=1e-5, rtol=1e-5), "mismatch (f32 path)"

    # 2) Narrowed streams: bf16 adj (0/1 mask is exact in bf16) + bf16 output
    #    -> ~50% less HBM traffic; tolerance relaxed for the bf16 write-back.
    out_bf16 = jax.block_until_ready(
        dense_att(x, adj.astype(jnp.bfloat16), weight, bias,
                  out_dtype=jnp.bfloat16))
    assert jnp.allclose(out_bf16.astype(jnp.float32), ref,
                        atol=1e-2, rtol=1e-2), "mismatch (bf16 streams)"

    # 3) Explicit small tiles to exercise the multi-step 2-D grid.
    out2 = jax.block_until_ready(dense_att(x, adj, weight, bias, tm=64, tn=128))
    assert jnp.allclose(out2, ref, atol=1e-5, rtol=1e-5), "mismatch (2-D grid)"

    # 4) Non-(8,128)-aligned n exercises the pad / slice path.
    n2 = 100
    x2 = jax.random.normal(kx, (n2, in_features), dtype=jnp.float32)
    adj2 = (jax.random.uniform(kadj, (n2, n2)) < 0.3).astype(jnp.float32)
    ref2 = dense_att_ref(x2, adj2, weight, bias)
    out3 = jax.block_until_ready(dense_att(x2, adj2, weight, bias))
    assert out3.shape == (n2, n2)
    assert jnp.allclose(out3, ref2, atol=1e-5, rtol=1e-5), "mismatch (padded n)"

    print("KERNEL_OK")
</pallas_src>

<mosaic_0001>
module attributes {stable_mosaic.version = 11 : i64} {
  func.func @dense_att_kernel(%arg0: i32, %arg1: i32, %arg2: memref<64x1xf32, #tpu.memory_space<vmem>>, %arg3: memref<1x256xf32, #tpu.memory_space<vmem>>, %arg4: memref<64x256xf32, #tpu.memory_space<vmem>>, %arg5: memref<64x256xf32, #tpu.memory_space<vmem>>) attributes {dimension_semantics = [#tpu.dimension_semantics<parallel>, #tpu.dimension_semantics<parallel>], iteration_bounds = array<i64: 4, 1>, scalar_prefetch = 0 : i64, scratch_operands = 0 : i64, tpu.core_type = #tpu.core_type<tc>, window_params = [{transform_indices = @transform_0, window_bounds = array<i64: 64, 1>}, {transform_indices = @transform_1, window_bounds = array<i64: 1, 256>}, {transform_indices = @transform_2, window_bounds = array<i64: 64, 256>}, {transform_indices = @transform_3, window_bounds = array<i64: 64, 256>}]} {
    %c0 = arith.constant 0 : index
    %c0_0 = arith.constant 0 : index
    %0 = vector.load %arg2[%c0, %c0_0] : memref<64x1xf32, #tpu.memory_space<vmem>>, vector<64x1xf32>
    %c0_1 = arith.constant 0 : index
    %c0_2 = arith.constant 0 : index
    %1 = vector.load %arg3[%c0_1, %c0_2] : memref<1x256xf32, #tpu.memory_space<vmem>>, vector<1x256xf32>
    %2 = vector.broadcast %0 : vector<64x1xf32> to vector<64x256xf32>
    %3 = vector.broadcast %1 : vector<1x256xf32> to vector<64x256xf32>
    %4 = arith.addf %2, %3 : vector<64x256xf32>
    %cst = arith.constant 5.000000e-01 : f32
    %5 = vector.broadcast %cst : f32 to vector<64x256xf32>
    %6 = arith.mulf %5, %4 : vector<64x256xf32>
    %7 = math.tanh %6 : vector<64x256xf32>
    %cst_3 = arith.constant 5.000000e-01 : f32
    %8 = vector.broadcast %cst_3 : f32 to vector<64x256xf32>
    %9 = arith.mulf %8, %7 : vector<64x256xf32>
    %cst_4 = arith.constant 5.000000e-01 : f32
    %10 = vector.broadcast %cst_4 : f32 to vector<64x256xf32>
    %11 = arith.addf %9, %10 : vector<64x256xf32>
    %c0_5 = arith.constant 0 : index
    %c0_6 = arith.constant 0 : index
    %12 = vector.load %arg4[%c0_5, %c0_6] : memref<64x256xf32, #tpu.memory_space<vmem>>, vector<64x256xf32>
    %13 = arith.mulf %12, %11 : vector<64x256xf32>
    %c0_7 = arith.constant 0 : index
    %c0_8 = arith.constant 0 : index
    %14 = vector.load %arg5[%c0_7, %c0_8] : memref<64x256xf32, #tpu.memory_space<vmem>>, vector<64x256xf32>
    tpu.vector_store %arg5[%c0_7, %c0_8], %13 {strides = array<i32>} : memref<64x256xf32, #tpu.memory_space<vmem>>, vector<64x256xf32>,
    return
  }
  func.func @transform_0(%arg0: i32, %arg1: i32) -> (i32, i32) {
    %c0_i32 = arith.constant 0 : i32
    %c0_i32_0 = arith.constant 0 : i32
    return %arg0, %c0_i32 : i32, i32
  }
  func.func @transform_1(%arg0: i32, %arg1: i32) -> (i32, i32) {
    %c0_i32 = arith.constant 0 : i32
    %c0_i32_0 = arith.constant 0 : i32
    return %c0_i32, %arg1 : i32, i32
  }
  func.func @transform_2(%arg0: i32, %arg1: i32) -> (i32, i32) {
    %c0_i32 = arith.constant 0 : i32
    return %arg0, %arg1 : i32, i32
  }
  func.func @transform_3(%arg0: i32, %arg1: i32) -> (i32, i32) {
    %c0_i32 = arith.constant 0 : i32
    return %arg0, %arg1 : i32, i32
  }
}

</mosaic_0001>

<bundles_post_ra>
// kernel: tpu_custom_call.1
= control target key start
LH: loop header
LB: loop body
LE: loop exit
PB: predicated region body
PF: predicated region fallthrough
CT: control target
= control target key end

     0   :  { %8 = vsyncpa [#allocation3], 0  ;;  %s1056_s0 = inlined_call_operand.vmem [shape: f32[256,1], index: 0, kind: input, shape index: {}]   ;;  %s1057_s1 = inlined_call_operand.vmem [shape: f32[1,256], index: 1, kind: input, shape index: {}]   ;;  %s1058_s2 = inlined_call_operand.hbm [shape: f32[256,256], index: 2, kind: input, shape index: {}]   ;;  %s1059_s3 = inlined_call_operand.hbm [shape: f32[256,256], index: 3, kind: output, shape index: {}]  }
   0x1   :  { %10 = vsyncpa [#allocation3 + $0x1], 0 }
   0x2   :  { %11 = vsyncpa [#allocation4], 0 }
   0x3   :  { %13 = vsyncpa [#allocation4 + $0x1], 0  ;;  %s835_s12 = smov 0   ;;  %s837_s13 = smov 0  }
   0x4   :  { %s839_s14 = smov 0   ;;  %s841_s15 = smov 0  }
   0x5   :  { %s843_s16 = smov 0   ;;  %s845_s17 = smov 0  }
   0x6 LB: > { %s569_s18 = sadd.s32 4294967295, %s806_s17   ;;  %s570_s19 = sadd.s32 4294967294, %s806_s17   ;;  %s806_s17 = sphi %s845_s17, %s19_s17   ;;  %s802_s16 = sphi %s843_s16, %s1073_s16   ;;  %s798_s15 = sphi %s841_s15, %s1072_s15   ;;  %s794_s14 = sphi %s839_s14, %s1071_s14   ;;  %s790_s13 = sphi %s837_s13, %s1070_s13   ;;  %s786_s12 = sphi %s835_s12, %s1069_s12  }
   0x7   : > { %s31_s20 = sadd.s32 1, %s802_s16  ;;  %s92_s21 = sadd.s32 1, %s794_s14 }
   0x8   : > { %p33_p0 = scmp.ge.s32.totalorder %s31_s20, 4  ;;  %p99_p1 = scmp.ne.s32.totalorder %s794_s14, %s790_s13 }
   0x9   : > { %p100_p2 = scmp.eq.s32.totalorder %s806_s17, 0  ;;  %p105_p3 = scmp.ne.s32.totalorder %s790_s13, %s786_s12 }
   0xa   : > { %s1075_s20 = smov (%p33_p0, %s31_s20), 0  ;;  %p106_p5 = scmp.eq.s32.totalorder %s569_s18, 0 }
   0xb   : > { %p876_p4 = por %p100_p2, %p99_p1  ;;  %s87_s23 = ssub.s32 %s802_s16, %s1075_s20 }
   0xc   : > { %p131_p6 = scmp.eq.s32.totalorder %s569_s18, 3  ;;  %p90_p7 = scmp.eq.s32.totalorder %s87_s23, 0 }
   0xd   : > { %p882_p8 = por %p106_p5, %p105_p3  ;;  %p137_p10 = scmp.eq.s32.totalorder %s570_s19, 3 }
   0xe   : > { %p886_p9 = por %p131_p6, %p99_p1  ;;  %p605_p12 = scmp.lt.s32.totalorder %s806_s17, 4 }
   0xf   : > { %s891_s26 = scalar_select %p90_p7, %s794_s14, %s92_s21  }
  0x10   : > { %s1063_s25 = scalar_select %p886_p9, 1, 0 }
  0x11   : > { %p893_p11 = por %p137_p10, %p105_p3  ;;  %s174_s28 = sand.u32 1, %s794_s14  }
  0x12   : > { %s574_s29 = sshll.u32 %s174_s28, 7  ;;  %s590_s30 = sshll.u32 %s802_s16, 11 }
  0x13   : > { %s1064_s27 = scalar_select %p893_p11, 1, 0 }
  0x14   : > { %s903_s6 = scalar_lea.hbm %s1058_s2, %s590_s30  ;;  %s178_s7 = scalar_lea.vmem [#allocation2], %s574_s29 }
  0x15   : > { %s188_s8 = sshll.u32 %s178_s7, 4  ;;  %p909_p13 = pnand %p605_p12, %p876_p4  ;;  %s905_s8 = int_to_ptr.vmem [resolvable:$true] %s188_s8 }
  0x16   : > { %s914_s10 = scalar_lea.sflag [#allocation3], %s174_s28  ;;  %s694_s11 = scalar_lea.hbm %s903_s6, 2048 }
  0x17   : > { %p695_p1 = scmp.ne.s32.totalorder %s903_s6, %s694_s11  ;;  %p696_p2 = pneg %p909_p13 }
  0x18   : > { %s699_s21 = scalar_lea.hbm %s1058_s2, 8192  ;;  %p700_p4 = scmp.lt.u32.totalorder %s903_s6, %s1058_s2 }
  0x19   : > { %p697_p3 = pnand %p696_p2, %p695_p1  ;;  %p701_p6 = scmp.lt.u32.totalorder %s699_s21, %s694_s11 }
  0x1a   : > { %p703_p10 = scmp.lt.u32.totalorder %s694_s11, %s903_s6 }
  0x1b   : > { %p698_p5 = pneg %p697_p3  ;;  %p702_p7 = por %p701_p6, %p700_p4 }
  0x1d   : > { %p704_p12 = por %p703_p10, %p702_p7 }
  0x1f   : > { %p705_p0 = pnand %p704_p12, %p698_p5 }
  0x21   : > { %708 = shalt.err (!%p705_p0)
}
  0x22   : > { %s709_s28 = scalar_lea.vmem %s905_s8, 2048  ;;  %s808_s29 = smov [#allocation2]  }
  0x23   : > { %p710_p1 = scmp.ne.s32.totalorder %s905_s8, %s709_s28  ;;  %s714_s30 = sshll.u32 %s808_s29, 4  ;;  %s715_s30 = int_to_ptr.vmem [resolvable:$false] %s714_s30 }
  0x24   : > { %s716_s4 = scalar_lea.vmem %s715_s30, 4096  ;;  %p717_p9 = scmp.lt.s32.totalorder %s905_s8, %s715_s30 }
  0x25   : > { %p712_p3 = pnand %p710_p1, %p696_p2  ;;  %p718_p4 = scmp.lt.s32.totalorder %s716_s4, %s709_s28 }
  0x27   : > { %p713_p11 = pneg %p712_p3  ;;  %p719_p6 = por %p718_p4, %p717_p9 }
  0x29   : > { %p720_p7 = pnand %p719_p6, %p713_p11 }
  0x2b   : > { %723 = shalt.err (!%p720_p7)
}
  0x2c   : > { %s809_s5 = smov 256   ;;  %s810_s7 = smov 16  }
  0x2d   : > { %600 = dma.hbm_to_vmem [thread:$0]  (!%p909_p13), %s903_s6, 2048, %s905_s8, %s914_s10, %s809_s5, %s809_s5, %s810_s7  }
  0x2e   : > { %p196_p0 = scmp.lt.s32.totalorder %s806_s17, 5  ;;  %p1066_p2 = scmp.ge.s32.totalorder %s806_s17, 1 }
  0x30   : > { %p197_p5 = pnand %p1066_p2, %p196_p0 }
  0x31   : > { %s946_s11 = sand.u32 (!%p197_p5), 1, %s790_s13  }
  0x32   : > { %200 = sbr.rel (%p197_p5) target bundleno = 244 (0xf4), region = 32  ;;  %s579_s18 = sshll.u32 (!%p197_p5), %s946_s11, 7 }
  0x33   : > { %s203_s19 = scalar_lea.sflag (!%p197_p5), [#allocation3], %s946_s11  ;;  %s952_s21 = scalar_lea.vmem (!%p197_p5), [#allocation2], %s579_s18 }
  0x39   : > { %777 = dma.done.wait (%p882_p8), %s203_s19, 2048  }
  0x3a   : > { %779 = vsyncadd (%p882_p8), %s203_s19, 4294965248  ;;  %s581_s6 = sshll.u32 %s798_s15, 3  ;;  %v811_v0 = vmov 0   ;;  %v303_v9 = vlaneseq  ;;  %v261_v13 = vld [vmem:[%s1057_s1] sm:$0x3]  ;;  %v398_v63 = vld [vmem:[%s952_s21 + $0x28] sm:$0xff] }
  0x3b   : > { %661 = vset.pattern.permute.xlu1 %v811_v0  ;;  %660 = vset.pattern.permute.xlu0 %v811_v0  ;;  %p239_p9 = scmp.lt.s32.totalorder %s581_s6, 31  ;;  %v397_v60 = vld [vmem:[%s952_s21 + $0x20] sm:$0xff]  ;;  %s972_s28 = scalar_lea.vmem [#allocation5], %s579_s18 }
  0x3c   : > { %v304_v10 = vshrl.u32 %v303_v9, 7  ;;  %s592_s29 = sshll.u32 %s798_s15, 11  ;;  %s458_s30 = sshll.u32 %s972_s28, 4  ;;  %s1005_s30 = int_to_ptr.vmem [resolvable:$true] %s458_s30 }
  0x3d   : > { %s1077_s6 = smov (!%p239_p9, %s581_s6), 31  ;;  %s1003_s7 = scalar_lea.hbm %s1059_s3, %s592_s29 }
  0x3e   : > { %s582_s8 = sshll.u32 %s1077_s6, 3  ;;  %v305_v11 = vsub.s32 0, %v304_v10  ;;  %v309_v12 = vsub.s32 1, %v304_v10  ;;  %s442_s15 = scalar_lea.sflag [#allocation4], %s946_s11 }
  0x3f   : > { %s242_s22 = scalar_lea.vmem %s1056_s0, %s582_s8  ;;  %s724_s18 = scalar_lea.vmem %s1005_s30, 2048 }
  0x40   : > { %v255_v1 = vld [vmem:[%s242_s22 + $0x10] sm:$0xff]  ;;  %v253_v2 = vld [vmem:[%s242_s22] sm:$0xff]  ;;  %v256_v3 = vld [vmem:[%s242_s22 + $0x18] sm:$0xff]  ;;  %v306_v14 = vrot.slane %v261_v13, %v305_v11  ;;  %v310_v15 = vrot.slane %v261_v13, %v309_v12  ;;  %p725_p8 = scmp.ne.s32.totalorder %s1005_s30, %s724_s18  ;;  %p1067_p11 = scmp.ne.s32.totalorder %s1063_s25, 0 }
  0x41   : > { %274 = vperm.xlu1 %661, %v255_v1   ;;  %264 = vperm.xlu0 %660, %v253_v2   ;;  %v254_v4 = vld [vmem:[%s242_s22 + $0x8] sm:$0xff]  ;;  %v257_v6 = vld [vmem:[%s242_s22 + $0x20] sm:$0xff]  ;;  %v260_v7 = vld [vmem:[%s242_s22 + $0x38] sm:$0xff]  ;;  %s812_s19 = smov [#allocation5]  }
  0x42   : > { %v258_v5 = vld [vmem:[%s242_s22 + $0x28] sm:$0xff]  ;;  %v259_v8 = vld [vmem:[%s242_s22 + $0x30] sm:$0xff]  ;;  %p726_p13 = pnand %p725_p8, %p1067_p11 }
  0x44   : > { %p727_p10 = pneg %p726_p13 }
  0x45   : > { %279 = vperm.xlu1 %661, %v256_v3   ;;  %269 = vperm.xlu0 %660, %v254_v4   ;;  %v393_v4 = vld [vmem:[%s952_s21] sm:$0xff] }
  0x49   : > { %289 = vperm.xlu1 %661, %v258_v5   ;;  %284 = vperm.xlu0 %660, %v257_v6  }
  0x4d   : > { %299 = vperm.xlu1 %661, %v260_v7   ;;  %294 = vperm.xlu0 %660, %v259_v8   ;;  %v394_v8 = vld [vmem:[%s952_s21 + $0x8] sm:$0xff] }
  0xc0   : > { %v275_v16 = vpop.permute.xlu1 %274  ;;  %v265_v17 = vpop.permute.xlu0 %264 }
  0xc1   : > { %v317_v18 = vadd.f32 %v306_v14, %v275_v16  ;;  %v318_v19 = vadd.f32 %v310_v15, %v275_v16  ;;  %v313_v20 = vadd.f32 %v306_v14, %v265_v17  ;;  %v314_v21 = vadd.f32 %v310_v15, %v265_v17 }
  0xc3   : > { %v333_v22 = vmul.f32 0.5, %v317_v18  ;;  %v334_v23 = vmul.f32 0.5, %v318_v19  ;;  %v329_v24 = vmul.f32 0.5, %v313_v20  ;;  %v330_v25 = vmul.f32 0.5, %v314_v21  ;;  %v400_v18 = vld [vmem:[%s952_s21 + $0x38] sm:$0xff] }
  0xc4   : > { %v280_v26 = vpop.permute.xlu1 %279  ;;  %v270_v27 = vpop.permute.xlu0 %269 }
  0xc5   : > { %662 = vtanh.f32 %v333_v22  ;;  %v319_v28 = vadd.f32 %v306_v14, %v280_v26  ;;  %v320_v29 = vadd.f32 %v310_v15, %v280_v26  ;;  %v315_v30 = vadd.f32 %v306_v14, %v270_v27 }
  0xc6   : > { %664 = vtanh.f32 %v334_v23  ;;  %v316_v31 = vadd.f32 %v310_v15, %v270_v27 }
  0xc7   : > { %666 = vtanh.f32 %v329_v24  ;;  %v335_v32 = vmul.f32 0.5, %v319_v28  ;;  %v336_v33 = vmul.f32 0.5, %v320_v29  ;;  %v331_v34 = vmul.f32 0.5, %v315_v30  ;;  %v395_v24 = vld [vmem:[%s952_s21 + $0x10] sm:$0xff]  ;;  %v396_v28 = vld [vmem:[%s952_s21 + $0x18] sm:$0xff] }
  0xc8   : > { %668 = vtanh.f32 %v330_v25  ;;  %v332_v35 = vmul.f32 0.5, %v316_v31  ;;  %v290_v36 = vpop.permute.xlu1 %289  ;;  %v285_v37 = vpop.permute.xlu0 %284 }
  0xc9   : > { %670 = vtanh.f32 %v335_v32  ;;  %v323_v38 = vadd.f32 %v306_v14, %v290_v36  ;;  %v324_v39 = vadd.f32 %v310_v15, %v290_v36  ;;  %v321_v40 = vadd.f32 %v306_v14, %v285_v37 }
  0xca   : > { %672 = vtanh.f32 %v336_v33  ;;  %v322_v41 = vadd.f32 %v310_v15, %v285_v37 }
  0xcb   : > { %674 = vtanh.f32 %v331_v34  ;;  %v339_v42 = vmul.f32 0.5, %v323_v38  ;;  %v340_v43 = vmul.f32 0.5, %v324_v39  ;;  %v337_v44 = vmul.f32 0.5, %v321_v40  ;;  %v403_v34 = vld [vmem:[%s952_s21 + $0x50] sm:$0xff]  ;;  %v404_v38 = vld [vmem:[%s952_s21 + $0x58] sm:$0xff] }
  0xcc   : > { %676 = vtanh.f32 %v332_v35  ;;  %v338_v45 = vmul.f32 0.5, %v322_v41  ;;  %v300_v46 = vpop.permute.xlu1 %299  ;;  %v295_v47 = vpop.permute.xlu0 %294 }
  0xcd   : > { %678 = vtanh.f32 %v339_v42  ;;  %v327_v48 = vadd.f32 %v306_v14, %v300_v46  ;;  %v328_v49 = vadd.f32 %v310_v15, %v300_v46  ;;  %v325_v50 = vadd.f32 %v306_v14, %v295_v47  ;;  %v399_v14 = vld [vmem:[%s952_s21 + $0x30] sm:$0xff] }
  0xce   : > { %680 = vtanh.f32 %v340_v43  ;;  %v326_v51 = vadd.f32 %v310_v15, %v295_v47 }
  0xcf   : > { %v663_v52 = vpop.eup %662  ;;  %682 = vtanh.f32 %v337_v44  ;;  %v343_v53 = vmul.f32 0.5, %v327_v48  ;;  %v344_v54 = vmul.f32 0.5, %v328_v49  ;;  %v341_v55 = vmul.f32 0.5, %v325_v50  ;;  %v401_v44 = vld [vmem:[%s952_s21 + $0x40] sm:$0xff]  ;;  %v402_v48 = vld [vmem:[%s952_s21 + $0x48] sm:$0xff] }
  0xd0   : > { %v665_v56 = vpop.eup %664  ;;  %v365_v57 = vmul.f32 0.5, %v663_v52  ;;  %684 = vtanh.f32 %v338_v45  ;;  %v342_v58 = vmul.f32 0.5, %v326_v51 }
  0xd1   : > { %v667_v59 = vpop.eup %666  ;;  %v366_v61 = vmul.f32 0.5, %v665_v56  ;;  %686 = vtanh.f32 %v343_v53 }
  0xd2   : > { %v669_v62 = vpop.eup %668  ;;  %v381_v0 = vadd.f32 0.5, %v365_v57  ;;  %v361_v1 = vmul.f32 0.5, %v667_v59  ;;  %688 = vtanh.f32 %v344_v54  ;;  %v407_v54 = vld [vmem:[%s952_s21 + $0x70] sm:$0xff] }
  0xd3   : > { %v671_v2 = vpop.eup %670  ;;  %v382_v3 = vadd.f32 0.5, %v366_v61  ;;  %v362_v5 = vmul.f32 0.5, %v669_v62  ;;  %690 = vtanh.f32 %v341_v55 }
  0xd4   : > { %v673_v6 = vpop.eup %672  ;;  %v413_v7 = vmul.f32 %v397_v60, %v381_v0  ;;  %v377_v9 = vadd.f32 0.5, %v361_v1  ;;  %v367_v10 = vmul.f32 0.5, %v671_v2  ;;  %692 = vtanh.f32 %v342_v58  ;;  %v408_v58 = vld [vmem:[%s952_s21 + $0x78] sm:$0xff]  ;;  %v406_v2 = vld [vmem:[%s952_s21 + $0x68] sm:$0xff] }
  0xd5   : > { %v675_v11 = vpop.eup %674  ;;  %v414_v12 = vmul.f32 %v398_v63, %v382_v3  ;;  %v378_v13 = vadd.f32 0.5, %v362_v5  ;;  %v368_v15 = vmul.f32 0.5, %v673_v6  ;;  %v405_v63 = vld [vmem:[%s952_s21 + $0x60] sm:$0xff]  ;;  %s728_s21 = sshll.u32 %s812_s19, 4  ;;  %s729_s21 = int_to_ptr.vmem [resolvable:$false] %s728_s21 }
  0xd6   : > { %v677_v16 = vpop.eup %676  ;;  %429 = vst [vmem:[%s972_s28 + $0x20] sm:$0xff] %v413_v7  ;;  %v409_v17 = vmul.f32 %v393_v4, %v377_v9  ;;  %v383_v19 = vadd.f32 0.5, %v367_v10  ;;  %v363_v20 = vmul.f32 0.5, %v675_v11  ;;  %s730_s6 = scalar_lea.vmem %s729_s21, 4096  ;;  %p731_p12 = scmp.lt.s32.totalorder %s1005_s30, %s729_s21 }
  0xd7   : > { %v679_v21 = vpop.eup %678  ;;  %430 = vst [vmem:[%s972_s28 + $0x28] sm:$0xff] %v414_v12  ;;  %v410_v22 = vmul.f32 %v394_v8, %v378_v13  ;;  %v384_v23 = vadd.f32 0.5, %v368_v15  ;;  %v364_v25 = vmul.f32 0.5, %v677_v16  ;;  %p732_p1 = scmp.lt.s32.totalorder %s730_s6, %s724_s18 }
  0xd8   : > { %v681_v26 = vpop.eup %680  ;;  %425 = vst [vmem:[%s972_s28] sm:$0xff] %v409_v17  ;;  %v415_v27 = vmul.f32 %v399_v14, %v383_v19  ;;  %v379_v29 = vadd.f32 0.5, %v363_v20  ;;  %v371_v30 = vmul.f32 0.5, %v679_v21 }
  0xd9   : > { %v683_v31 = vpop.eup %682  ;;  %426 = vst [vmem:[%s972_s28 + $0x8] sm:$0xff] %v410_v22  ;;  %v416_v32 = vmul.f32 %v400_v18, %v384_v23  ;;  %v380_v33 = vadd.f32 0.5, %v364_v25  ;;  %v372_v35 = vmul.f32 0.5, %v681_v26  ;;  %p733_p3 = por %p732_p1, %p731_p12 }
  0xda   : > { %v685_v36 = vpop.eup %684  ;;  %431 = vst [vmem:[%s972_s28 + $0x30] sm:$0xff] %v415_v27  ;;  %v411_v37 = vmul.f32 %v395_v24, %v379_v29  ;;  %v387_v39 = vadd.f32 0.5, %v371_v30  ;;  %v369_v40 = vmul.f32 0.5, %v683_v31 }
  0xdb   : > { %v687_v41 = vpop.eup %686  ;;  %432 = vst [vmem:[%s972_s28 + $0x38] sm:$0xff] %v416_v32  ;;  %v412_v42 = vmul.f32 %v396_v28, %v380_v33  ;;  %v388_v43 = vadd.f32 0.5, %v372_v35  ;;  %v370_v45 = vmul.f32 0.5, %v685_v36  ;;  %p734_p4 = pnand %p733_p3, %p727_p10 }
  0xdc   : > { %v689_v46 = vpop.eup %688  ;;  %427 = vst [vmem:[%s972_s28 + $0x10] sm:$0xff] %v411_v37  ;;  %v419_v47 = vmul.f32 %v403_v34, %v387_v39  ;;  %v385_v49 = vadd.f32 0.5, %v369_v40  ;;  %v375_v50 = vmul.f32 0.5, %v687_v41 }
  0xdd   : > { %v691_v51 = vpop.eup %690  ;;  %428 = vst [vmem:[%s972_s28 + $0x18] sm:$0xff] %v412_v42  ;;  %v420_v52 = vmul.f32 %v404_v38, %v388_v43  ;;  %v386_v53 = vadd.f32 0.5, %v370_v45  ;;  %v376_v55 = vmul.f32 0.5, %v689_v46 }
  0xde   : > { %v693_v56 = vpop.eup %692  ;;  %435 = vst [vmem:[%s972_s28 + $0x50] sm:$0xff] %v419_v47  ;;  %v417_v57 = vmul.f32 %v401_v44, %v385_v49  ;;  %v391_v59 = vadd.f32 0.5, %v375_v50  ;;  %v373_v60 = vmul.f32 0.5, %v691_v51 }
  0xdf   : > { %436 = vst [vmem:[%s972_s28 + $0x58] sm:$0xff] %v420_v52  ;;  %v418_v61 = vmul.f32 %v402_v48, %v386_v53  ;;  %v392_v62 = vadd.f32 0.5, %v376_v55  ;;  %v374_v0 = vmul.f32 0.5, %v693_v56 }
  0xe0   : > { %433 = vst [vmem:[%s972_s28 + $0x40] sm:$0xff] %v417_v57  ;;  %v423_v1 = vmul.f32 %v407_v54, %v391_v59  ;;  %v389_v3 = vadd.f32 0.5, %v373_v60 }
  0xe1   : > { %434 = vst [vmem:[%s972_s28 + $0x48] sm:$0xff] %v418_v61  ;;  %v424_v4 = vmul.f32 %v408_v58, %v392_v62  ;;  %v390_v5 = vadd.f32 0.5, %v374_v0 }
  0xe2   : > { %439 = vst [vmem:[%s972_s28 + $0x70] sm:$0xff] %v423_v1  ;;  %v421_v6 = vmul.f32 %v405_v63, %v389_v3 }
  0xe3   : > { %440 = vst [vmem:[%s972_s28 + $0x78] sm:$0xff] %v424_v4  ;;  %v422_v7 = vmul.f32 %v406_v2, %v390_v5 }
  0xe4   : > { %437 = vst [vmem:[%s972_s28 + $0x60] sm:$0xff] %v421_v6 }
  0xe5   : > { %438 = vst [vmem:[%s972_s28 + $0x68] sm:$0xff] %v422_v7 }
  0xe6   : > { %737 = shalt.err (!%p734_p4)
}
  0xe7   : > { %s738_s8 = scalar_lea.hbm %s1003_s7, 2048  ;;  %s742_s22 = scalar_lea.hbm %s1059_s3, 8192 }
  0xe8   : > { %p739_p6 = scmp.ne.s32.totalorder %s1003_s7, %s738_s8  ;;  %p743_p2 = scmp.lt.u32.totalorder %s1003_s7, %s1059_s3 }
  0xe9   : > { %p744_p5 = scmp.lt.u32.totalorder %s742_s22, %s738_s8  ;;  %p746_p8 = scmp.lt.u32.totalorder %s738_s8, %s1003_s7 }
  0xea   : > { %p740_p7 = pnand %p739_p6, %p1067_p11 }
  0xeb   : > { %p745_p9 = por %p744_p5, %p743_p2 }
  0xec   : > { %p741_p0 = pneg %p740_p7 }
  0xed   : > { %p747_p13 = por %p746_p8, %p745_p9 }
  0xef   : > { %p748_p10 = pnand %p747_p13, %p741_p0 }
  0xf1   : > { %751 = shalt.err (!%p748_p10)
}
  0xf2   : > { %s813_s28 = smov 256   ;;  %s814_s29 = smov 16  }
  0xf3   : > { %595 = dma.vmem_to_hbm [thread:$0]  (%p1067_p11), %s1005_s30, 2048, %s1003_s7, %s442_s15, %s813_s28, %s813_s28, %s814_s29  }
  0xf4 PF: > { %p606_p12 = scmp.ge.s32.totalorder %s806_s17, 2  ;;  %s473_s4 = sand.u32 1, %s786_s12  }
  0xf5   : > { %p1068_p1 = scmp.ne.s32.totalorder %s1064_s27, 0  ;;  %s474_s5 = scalar_lea.sflag [#allocation4], %s473_s4 }
  0xf7   : > { %p602_p3 = pnand %p606_p12, %p1068_p1 }
  0xf9   : > { %781 = dma.done.wait (!%p602_p3), %s474_s5, 2048  }
  0xfa   : > { %783 = vsyncadd (!%p602_p3), %s474_s5, 4294965248  ;;  %s19_s17 = sadd.s32 1, %s806_s17   ;;  %s1069_s12 = smov %s790_s13 }
  0xfb   : > { %p16_p4 = scmp.ge.s32.totalorder %s19_s17, 6   ;;  %s1070_s13 = smov %s794_s14 }
  0xfc   : > { %s1071_s14 = smov %s891_s26  ;;  %s1072_s15 = smov %s802_s16 }
  0xfd   : > { %s1073_s16 = smov %s1075_s20  ;;  %18 = sbr.rel (!%p16_p4) target bundleno = 6 (0x6), region = 83 }
 0x104   :  { %479 = vsyncpa [#allocation3], 1 }
 0x105   :  { %481 = vsyncpa [#allocation3 + $0x1], 1 }
 0x106   :  { %482 = vsyncpa [#allocation4], 1 }
 0x107   :  { %484 = vsyncpa [#allocation4 + $0x1], 1 }

</bundles_post_ra>
